<compile_context>
chip_gen: v7x
topology: tpu7x:2x2x1
jax: 0.10.0
libtpu: 0.0.40
codegen_flags: <defaults>
</compile_context>

<pallas_src>
import functools
import math

import jax
import jax.numpy as jnp
from jax import lax
from jax.experimental import pallas as pl
from jax.experimental.pallas import tpu as pltpu

_INV_SQRT2 = 1.0 / math.sqrt(2.0)
_SQRT_2_OVER_PI = math.sqrt(2.0 / math.pi)
_DEPTH_CH = 512  # fixed by the module: nn.Linear(512, embed_dims)


def _adaptor_kernel(x_ref, d_ref, w1_ref, b1_ref, w2_ref, b2_ref, o_ref, *,
                    mxu_dtype, approx):
    """One (F, l_tile) channel-major block of tokens for one batch element.

    x_ref : (F, l_tile)   image features, channel-major (native dtype)
    d_ref : (C, l_tile)   depth features, channel-major (stored / stream dtype)
    w1_ref: (F, F)  (in, out)      b1_ref: (F, 1) f32
    w2_ref: (C, F)  (in, out)      b2_ref: (F, 1) f32
    o_ref : (F, l_tile)   output block (lane-dense stores)
    """
    # ---- image projection: Linear(F, F) + GELU, f32 accumulate & epilogue ----
    # (W1^T on the LHS so the result is already channel-major.)
    h = lax.dot_general(
        w1_ref[...], x_ref[...],
        dimension_numbers=(((0,), (0,)), ((), ())),     # (F_in,F_out)x(F_in,l) -> (F_out,l)
        preferred_element_type=jnp.float32) + b1_ref[...]
    if approx:
        # tanh-approx GELU: the transcendental runs on the (otherwise idle) EUP slot.
        u = _SQRT_2_OVER_PI * (h + 0.044715 * (h * h * h))
        g = 0.5 * h * (1.0 + jnp.tanh(u))
    else:
        g = 0.5 * h * (1.0 + lax.erf(h * _INV_SQRT2))   # exact erf GELU

    # ---- depth projection: Linear(512, F) + Sigmoid ---------------------------
    # Depth arrives channel-major (C, l_tile) in its stored dtype; the narrow
    # MXU cast happens here in VMEM (free w.r.t. HBM traffic).  The PyTorch
    # permute(0, 2, 1) never materializes anywhere.
    d = d_ref[...]
    if d.dtype != mxu_dtype:
        d = d.astype(mxu_dtype)
    s = lax.dot_general(
        w2_ref[...], d,
        dimension_numbers=(((0,), (0,)), ((), ())),     # (C,F)x(C,l) -> (F,l)
        preferred_element_type=jnp.float32) + b2_ref[...]
    if approx:
        # sigmoid = 1 / (1 + exp(-s)); exp + approx reciprocal both go to the EUP.
        sig = pl.reciprocal(1.0 + jnp.exp(-s), approx=True)
    else:
        sig = jax.nn.sigmoid(s)

    # out = g + 0.01 * g * sig == g * (1 + 0.01 * sig)
    o_ref[...] = (g * (1.0 + 0.01 * sig)).astype(o_ref.dtype)


def _choose_tiling(L, B, cap=2048, min_grid=4):
    """Pick (l_tile, Lp).

    Prefers the largest multiple-of-128 tile that divides L (no pad pass over
    the dominant depth stream) while keeping B * (L / l_tile) >= min_grid so
    v7x's two TensorCores both get grid steps.  Falls back to a single full-L
    tile for small L, and only pads L as a last resort.
    """
    cands = [d for d in range(128, min(cap, L) + 1, 128) if L % d == 0]
    if cands:
        for d in sorted(cands, reverse=True):
            if B * (L // d) >= min_grid:
                return d, L
        return min(cands), L       # tiny problem: maximize parallelism instead
    if L <= cap:
        return L, L                # single full-L tile (legal: equals array dim)
    # Last resort: L > cap with no 128-multiple divisor -> pad (one extra pass
    # over the padded streams; essentially never hit for perfect-square L).
    Lp = pl.cdiv(L, 128) * 128
    cands = [d for d in range(128, min(cap, Lp) + 1, 128) if Lp % d == 0]
    for d in sorted(cands, reverse=True):
        if B * (Lp // d) >= min_grid:
            return d, Lp
    return min(cands), Lp


def depth_aware_adaptor(image_feature, adaptor_depth, params, *,
                        precise=False, l_tile=None, out_dtype=None,
                        channel_major_output=False, depth_buffers=None):
    """image_feature: (B, L, F); adaptor_depth: (B, 512, Hd, Wd).

    precise=False (default): bf16 depth stream on the MXU + EUP-approx epilogue
    (tolerance-gated in __main__).  precise=True: stored-dtype MXU stream,
    exact erf GELU and exact sigmoid.
    """
    w1, b1, w2, b2 = params["w1"], params["b1"], params["w2"], params["b2"]
    B, L, F = image_feature.shape
    W = int(round(L ** 0.5))
    assert W * W == L, "L must be a perfect square"
    Bd, C, Hd, Wd = adaptor_depth.shape
    assert C == _DEPTH_CH and Bd == B

    out_dtype = image_feature.dtype if out_dtype is None else out_dtype
    mxu_dtype = adaptor_depth.dtype if precise else jnp.bfloat16

    if l_tile is None:
        l_tile, Lp = _choose_tiling(L, B)
    else:
        assert l_tile == L or l_tile % 128 == 0, (
            "l_tile must be the full token count or a multiple of 128")
        Lp = pl.cdiv(L, l_tile) * l_tile

    # ---- depth stream (the dominant HBM traffic) ------------------------------
    if (Hd, Wd) == (W, W):
        # No resample: stream the stored slab directly.  The reshape is a free
        # view; the narrow MXU cast happens in VMEM inside the kernel, so no
        # extra HBM pass is added here.
        depth = adaptor_depth.reshape(B, C, L)
        if Lp != L:
            # Rare last-resort fallback (extra pass); _choose_tiling avoids it.
            depth = jnp.pad(depth, ((0, 0), (0, 0), (0, Lp - L)))
    else:
        # Nearest-neighbour resample fused with flatten + L-pad + dtype cast in
        # ONE gather: the resampled (B, C, Lp) slab is materialized exactly
        # once, directly in the streaming dtype (bf16 on the fast path).
        # torch F.interpolate(mode='nearest'): src_idx = floor(dst_idx * in/out)
        # TODO(synk): for integer ratios, pull the gather into the kernel
        # (strided pl.ds / scalar-prefetched manual DMA) to skip this slab.
        idx_h = (jnp.arange(W) * Hd) // W
        idx_w = (jnp.arange(W) * Wd) // W
        flat = (idx_h[:, None] * Wd + idx_w[None, :]).reshape(L)
        if Lp != L:
            flat = jnp.concatenate([flat, jnp.zeros((Lp - L,), flat.dtype)])
        depth = jnp.take(adaptor_depth.reshape(B, C, Hd * Wd), flat, axis=2)
        depth = depth.astype(mxu_dtype)

    # ---- image features: channel-major so the whole kernel is lane-dense ------
    # (Tiny stream; a channel-major producer could feed (B, F, L) directly.)
    x_cm = jnp.transpose(image_feature, (0, 2, 1))          # (B, F, L)
    if Lp != L:
        x_cm = jnp.pad(x_cm, ((0, 0), (0, 0), (0, Lp - L)))

    # Weights match the MXU operand dtypes; biases stay f32 for the f32 epilogue.
    w1c = w1.astype(image_feature.dtype)
    w2c = w2.astype(mxu_dtype)
    b1c = b1.reshape(F, 1).astype(jnp.float32)
    b2c = b2.reshape(F, 1).astype(jnp.float32)

    grid = (B, Lp // l_tile)

    # ---- VMEM budget: scale with the real tile footprint (~2x estimate), keep
    # a modest floor and stay well inside v7x's 64 MiB physical VMEM.
    xb = jnp.dtype(x_cm.dtype).itemsize
    db = jnp.dtype(depth.dtype).itemsize
    ob = jnp.dtype(out_dtype).itemsize
    wb = jnp.dtype(w2c.dtype).itemsize
    est = (2 * l_tile * (F * xb + C * db + F * ob)            # double-buffered streams
           + 2 * (F * F * xb + C * F * wb + 2 * F * 4))       # grid-resident weights/biases
    vmem_limit = int(min(max(2 * est, 16 << 20), 56 << 20))

    depth_spec_kwargs = {}
    if depth_buffers is not None and depth_buffers != 2:
        # Optional pipeline-depth sweep knob (keep only if a measured >5% win).
        depth_spec_kwargs["pipeline_mode"] = pl.Buffered(depth_buffers)
    depth_spec = pl.BlockSpec((None, C, l_tile), lambda b, l: (b, 0, l),
                              **depth_spec_kwargs)

    out_cm = pl.pallas_call(
        functools.partial(_adaptor_kernel, mxu_dtype=mxu_dtype, approx=not precise),
        out_shape=jax.ShapeDtypeStruct((B, F, Lp), out_dtype),
        grid_spec=pltpu.PrefetchScalarGridSpec(
            num_scalar_prefetch=0,
            grid=grid,
            in_specs=[
                pl.BlockSpec((None, F, l_tile), lambda b, l: (b, 0, l)),  # x (chan-major)
                depth_spec,                                               # depth (chan-major)
                pl.BlockSpec((F, F), lambda b, l: (0, 0)),                # W1 (grid-resident)
                pl.BlockSpec((F, 1), lambda b, l: (0, 0)),                # b1
                pl.BlockSpec((C, F), lambda b, l: (0, 0)),                # W2 (grid-resident)
                pl.BlockSpec((F, 1), lambda b, l: (0, 0)),                # b2
            ],
            out_specs=pl.BlockSpec((None, F, l_tile), lambda b, l: (b, 0, l)),
        ),
        compiler_params=pltpu.CompilerParams(
            dimension_semantics=("parallel", "parallel"),
            vmem_limit_bytes=vmem_limit,
        ),
    )(x_cm, depth, w1c, b1c, w2c, b2c)

    if Lp != L:
        out_cm = out_cm[:, :, :L]
    if channel_major_output:
        return out_cm                                   # (B, F, L) for chan-major consumers
    return jnp.transpose(out_cm, (0, 2, 1))             # (B, L, F), module layout


def _reference(image_feature, adaptor_depth, params):
    """Pure-JAX f32 reference matching the PyTorch forward."""
    w1, b1, w2, b2 = params["w1"], params["b1"], params["w2"], params["b2"]
    B, L, F = image_feature.shape
    W = int(round(L ** 0.5))
    _, C, Hd, Wd = adaptor_depth.shape
    x = image_feature.astype(jnp.float32) @ w1 + b1
    x = jax.nn.gelu(x, approximate=False)
    idx_h = (jnp.arange(W) * Hd) // W
    idx_w = (jnp.arange(W) * Wd) // W
    depth = adaptor_depth[:, :, idx_h, :][:, :, :, idx_w]
    depth = depth.reshape(B, C, L).transpose(0, 2, 1).astype(jnp.float32)
    d = jax.nn.sigmoid(depth @ w2 + b2)
    return (x + 0.01 * (x * d)).astype(image_feature.dtype)


def init_params(key, embed_dims):
    """Deterministic synthetic init matching nn.Linear shapes (stored as (in, out))."""
    k1, k2, k3, k4 = jax.random.split(key, 4)
    F = embed_dims
    s1 = 1.0 / math.sqrt(F)
    s2 = 1.0 / math.sqrt(_DEPTH_CH)
    return {
        "w1": jax.random.uniform(k1, (F, F), jnp.float32, -s1, s1),
        "b1": jax.random.uniform(k2, (F,), jnp.float32, -s1, s1),
        "w2": jax.random.uniform(k3, (_DEPTH_CH, F), jnp.float32, -s2, s2),
        "b2": jax.random.uniform(k4, (F,), jnp.float32, -s2, s2),
    }


if __name__ == "__main__":
    key = jax.random.PRNGKey(0)
    kx, kd, kd2, kp = jax.random.split(key, 4)

    B = 2
    embed_dims = 32       # F
    W = 8
    L = W * W             # 64 tokens -> sqrt(L) = 8
    Hd, Wd = 16, 16       # raw depth-map spatial size (resampled down to 8x8)

    image_feature = jax.random.normal(kx, (B, L, embed_dims), jnp.float32)
    adaptor_depth = jax.random.normal(kd, (B, _DEPTH_CH, Hd, Wd), jnp.float32)
    # prompt_feature is unused by the forward pass (kept for signature parity).
    prompt_feature = jnp.zeros((B, 4, embed_dims), jnp.float32)

    params = init_params(kp, embed_dims)
    ref = _reference(image_feature, adaptor_depth, params)

    # 1) Precise path (stored-dtype MXU stream, exact erf GELU / sigmoid),
    #    resample branch: tight tolerance vs the f32 reference.
    out_p = depth_aware_adaptor(image_feature, adaptor_depth, params, precise=True)
    out_p = jax.block_until_ready(out_p)
    assert out_p.shape == (B, L, embed_dims)
    assert jnp.allclose(out_p, ref, atol=1e-5, rtol=1e-5), \
        float(jnp.max(jnp.abs(out_p - ref)))

    # 2) Fast path (default: bf16 depth on the MXU, tanh-GELU + approx-recip
    #    sigmoid on the EUP), resample branch.  Gate is dominated by the
    #    documented tanh-GELU approximation (~1e-3 max abs); the bf16 / approx
    #    sigmoid error is damped by the 0.01 blend scale.
    out_f = depth_aware_adaptor(image_feature, adaptor_depth, params)
    out_f = jax.block_until_ready(out_f)
    assert out_f.shape == (B, L, embed_dims)
    assert jnp.allclose(out_f, ref, atol=2e-3, rtol=1e-3), \
        float(jnp.max(jnp.abs(out_f - ref)))

    # 3) Fast path, NO-resample branch: depth already at the target resolution,
    #    streamed straight from its stored layout/dtype (no HBM copy; bf16 cast
    #    happens in VMEM inside the kernel).
    adaptor_depth_native = jax.random.normal(kd2, (B, _DEPTH_CH, W, W), jnp.float32)
    ref2 = _reference(image_feature, adaptor_depth_native, params)
    out_n = depth_aware_adaptor(image_feature, adaptor_depth_native, params)
    out_n = jax.block_until_ready(out_n)
    assert out_n.shape == (B, L, embed_dims)
    assert jnp.allclose(out_n, ref2, atol=2e-3, rtol=1e-3), \
        float(jnp.max(jnp.abs(out_n - ref2)))

    print("KERNEL_OK")
</pallas_src>

<mosaic_0001>
module attributes {stable_mosaic.version = 11 : i64} {
  func.func @_adaptor_kernel(%arg0: i32, %arg1: i32, %arg2: memref<1x32x64xf32, #tpu.memory_space<vmem>>, %arg3: memref<1x512x64xf32, #tpu.memory_space<vmem>>, %arg4: memref<32x32xf32, #tpu.memory_space<vmem>>, %arg5: memref<32x1xf32, #tpu.memory_space<vmem>>, %arg6: memref<512x32xf32, #tpu.memory_space<vmem>>, %arg7: memref<32x1xf32, #tpu.memory_space<vmem>>, %arg8: memref<1x32x64xf32, #tpu.memory_space<vmem>>) attributes {dimension_semantics = [#tpu.dimension_semantics<parallel>, #tpu.dimension_semantics<parallel>], iteration_bounds = array<i64: 2, 1>, scalar_prefetch = 0 : i64, scratch_operands = 0 : i64, tpu.core_type = #tpu.core_type<tc>, window_params = [{transform_indices = @transform_0, window_bounds = array<i64: 1, 32, 64>}, {transform_indices = @transform_1, window_bounds = array<i64: 1, 512, 64>}, {pipeline_mode = #tpu.pipeline_mode<synchronous>, transform_indices = @transform_2, window_bounds = array<i64: 32, 32>}, {pipeline_mode = #tpu.pipeline_mode<synchronous>, transform_indices = @transform_3, window_bounds = array<i64: 32, 1>}, {pipeline_mode = #tpu.pipeline_mode<synchronous>, transform_indices = @transform_4, window_bounds = array<i64: 512, 32>}, {pipeline_mode = #tpu.pipeline_mode<synchronous>, transform_indices = @transform_5, window_bounds = array<i64: 32, 1>}, {transform_indices = @transform_6, window_bounds = array<i64: 1, 32, 64>}]} {
    %c0 = arith.constant 0 : index
    %c0_0 = arith.constant 0 : index
    %0 = vector.load %arg4[%c0, %c0_0] : memref<32x32xf32, #tpu.memory_space<vmem>>, vector<32x32xf32>
    %c0_1 = arith.constant 0 : index
    %c0_2 = arith.constant 0 : index
    %c0_3 = arith.constant 0 : index
    %1 = vector.load %arg2[%c0_1, %c0_2, %c0_3] : memref<1x32x64xf32, #tpu.memory_space<vmem>>, vector<1x32x64xf32>
    %2 = vector.shape_cast %1 : vector<1x32x64xf32> to vector<32x64xf32>
    %cst = arith.constant dense<0.000000e+00> : vector<32x64xf32>
    %3 = tpu.matmul %0, %2, %cst {dimension_numbers = #tpu.dot_dimension_numbers<[0], [0], [1], [1], [0, 1, 1, 1], [], []>} : vector<32x32xf32>, vector<32x64xf32>, vector<32x64xf32> -> vector<32x64xf32>
    %c0_4 = arith.constant 0 : index
    %c0_5 = arith.constant 0 : index
    %4 = vector.load %arg5[%c0_4, %c0_5] : memref<32x1xf32, #tpu.memory_space<vmem>>, vector<32x1xf32>
    %5 = vector.broadcast %4 : vector<32x1xf32> to vector<32x64xf32>
    %6 = arith.addf %3, %5 : vector<32x64xf32>
    %cst_6 = arith.constant 5.000000e-01 : f32
    %7 = vector.broadcast %cst_6 : f32 to vector<32x64xf32>
    %8 = arith.mulf %7, %6 : vector<32x64xf32>
    %cst_7 = arith.constant 0.707106769 : f32
    %9 = vector.broadcast %cst_7 : f32 to vector<32x64xf32>
    %10 = arith.mulf %6, %9 : vector<32x64xf32>
    %11 = math.erf %10 : vector<32x64xf32>
    %cst_8 = arith.constant 1.000000e+00 : f32
    %12 = vector.broadcast %cst_8 : f32 to vector<32x64xf32>
    %13 = arith.addf %12, %11 : vector<32x64xf32>
    %14 = arith.mulf %8, %13 : vector<32x64xf32>
    %c0_9 = arith.constant 0 : index
    %c0_10 = arith.constant 0 : index
    %c0_11 = arith.constant 0 : index
    %15 = vector.load %arg3[%c0_9, %c0_10, %c0_11] : memref<1x512x64xf32, #tpu.memory_space<vmem>>, vector<1x512x64xf32>
    %16 = vector.shape_cast %15 : vector<1x512x64xf32> to vector<512x64xf32>
    %c0_12 = arith.constant 0 : index
    %c0_13 = arith.constant 0 : index
    %17 = vector.load %arg6[%c0_12, %c0_13] : memref<512x32xf32, #tpu.memory_space<vmem>>, vector<512x32xf32>
    %cst_14 = arith.constant dense<0.000000e+00> : vector<32x64xf32>
    %18 = tpu.matmul %17, %16, %cst_14 {dimension_numbers = #tpu.dot_dimension_numbers<[0], [0], [1], [1], [0, 1, 1, 1], [], []>} : vector<512x32xf32>, vector<512x64xf32>, vector<32x64xf32> -> vector<32x64xf32>
    %c0_15 = arith.constant 0 : index
    %c0_16 = arith.constant 0 : index
    %19 = vector.load %arg7[%c0_15, %c0_16] : memref<32x1xf32, #tpu.memory_space<vmem>>, vector<32x1xf32>
    %20 = vector.broadcast %19 : vector<32x1xf32> to vector<32x64xf32>
    %21 = arith.addf %18, %20 : vector<32x64xf32>
    %22 = arith.negf %21 : vector<32x64xf32>
    %23 = math.exp %22 : vector<32x64xf32>
    %cst_17 = arith.constant 1.000000e+00 : f32
    %24 = vector.broadcast %cst_17 : f32 to vector<32x64xf32>
    %25 = arith.addf %24, %23 : vector<32x64xf32>
    %26 = arith.divf %24, %25 : vector<32x64xf32>
    %cst_18 = arith.constant 0.00999999977 : f32
    %27 = vector.broadcast %cst_18 : f32 to vector<32x64xf32>
    %28 = arith.mulf %27, %26 : vector<32x64xf32>
    %cst_19 = arith.constant 1.000000e+00 : f32
    %29 = vector.broadcast %cst_19 : f32 to vector<32x64xf32>
    %30 = arith.addf %29, %28 : vector<32x64xf32>
    %31 = arith.mulf %14, %30 : vector<32x64xf32>
    %c0_20 = arith.constant 0 : index
    %c0_21 = arith.constant 0 : index
    %c0_22 = arith.constant 0 : index
    %32 = vector.load %arg8[%c0_20, %c0_21, %c0_22] : memref<1x32x64xf32, #tpu.memory_space<vmem>>, vector<1x32x64xf32>
    %33 = vector.shape_cast %32 : vector<1x32x64xf32> to vector<32x64xf32>
    %34 = vector.shape_cast %31 : vector<32x64xf32> to vector<1x32x64xf32>
    tpu.vector_store %arg8[%c0_20, %c0_21, %c0_22], %34 {strides = array<i32>} : memref<1x32x64xf32, #tpu.memory_space<vmem>>, vector<1x32x64xf32>,
    return
  }
  func.func @transform_0(%arg0: i32, %arg1: i32) -> (i32, i32, i32) {
    %c0_i32 = arith.constant 0 : i32
    %c0_i32_0 = arith.constant 0 : i32
    return %arg0, %c0_i32, %arg1 : i32, i32, i32
  }
  func.func @transform_1(%arg0: i32, %arg1: i32) -> (i32, i32, i32) {
    %c0_i32 = arith.constant 0 : i32
    %c0_i32_0 = arith.constant 0 : i32
    return %arg0, %c0_i32, %arg1 : i32, i32, i32
  }
  func.func @transform_2(%arg0: i32, %arg1: i32) -> (i32, i32) {
    %c0_i32 = arith.constant 0 : i32
    %c0_i32_0 = arith.constant 0 : i32
    %c0_i32_1 = arith.constant 0 : i32
    return %c0_i32, %c0_i32_0 : i32, i32
  }
  func.func @transform_3(%arg0: i32, %arg1: i32) -> (i32, i32) {
    %c0_i32 = arith.constant 0 : i32
    %c0_i32_0 = arith.constant 0 : i32
    %c0_i32_1 = arith.constant 0 : i32
    return %c0_i32, %c0_i32_0 : i32, i32
  }
  func.func @transform_4(%arg0: i32, %arg1: i32) -> (i32, i32) {
    %c0_i32 = arith.constant 0 : i32
    %c0_i32_0 = arith.constant 0 : i32
    %c0_i32_1 = arith.constant 0 : i32
    return %c0_i32, %c0_i32_0 : i32, i32
  }
  func.func @transform_5(%arg0: i32, %arg1: i32) -> (i32, i32) {
    %c0_i32 = arith.constant 0 : i32
    %c0_i32_0 = arith.constant 0 : i32
    %c0_i32_1 = arith.constant 0 : i32
    return %c0_i32, %c0_i32_0 : i32, i32
  }
  func.func @transform_6(%arg0: i32, %arg1: i32) -> (i32, i32, i32) {
    %c0_i32 = arith.constant 0 : i32
    %c0_i32_0 = arith.constant 0 : i32
    return %arg0, %c0_i32, %arg1 : i32, i32, i32
  }
}

</mosaic_0001>

<bundles_post_ra>
// kernel: tpu_custom_call.1
= control target key start
LH: loop header
LB: loop body
LE: loop exit
PB: predicated region body
PF: predicated region fallthrough
CT: control target
= control target key end

     0   :  { %11 = vsyncpa [#allocation3], 0  ;;  %s2030_s0 = inlined_call_operand.vmem [shape: f32[2,32,64], index: 0, kind: input, shape index: {}]   ;;  %s2031_s1 = inlined_call_operand.vmem [shape: f32[2,512,64], index: 1, kind: input, shape index: {}]   ;;  %s2032_s2 = inlined_call_operand.vmem [shape: f32[32,32], index: 2, kind: input, shape index: {}]   ;;  %s2033_s3 = inlined_call_operand.vmem [shape: f32[32,1], index: 3, kind: input, shape index: {}]   ;;  %s2034_s4 = inlined_call_operand.vmem [shape: f32[512,32], index: 4, kind: input, shape index: {}]   ;;  %s2035_s5 = inlined_call_operand.vmem [shape: f32[32,1], index: 5, kind: input, shape index: {}]   ;;  %s2036_s6 = inlined_call_operand.hbm [shape: f32[2,32,64], index: 6, kind: output, shape index: {}]  }
   0x1   :  { %13 = vsyncpa [#allocation3 + $0x1], 0  ;;  %s1606_s21 = smov 0   ;;  %s1608_s22 = smov 0  }
   0x2   :  { %s1610_s23 = smov 0   ;;  %s1612_s24 = smov 0  }
   0x3   :  { %s1614_s25 = smov 0   ;;  %s1616_s26 = smov 0  }
   0x4 LB: > { %s1090_s27 = sadd.s32 4294967295, %s1565_s26   ;;  %s1091_s28 = sadd.s32 4294967294, %s1565_s26   ;;  %s1565_s26 = sphi %s1616_s26, %s19_s26   ;;  %s1561_s25 = sphi %s1614_s25, %s2043_s25   ;;  %s1557_s24 = sphi %s1612_s24, %s2042_s24   ;;  %s1553_s23 = sphi %s1610_s23, %s2041_s23   ;;  %s1549_s22 = sphi %s1608_s22, %s2040_s22   ;;  %s1545_s21 = sphi %s1606_s21, %s2039_s21  }
   0x5   : > { %s31_s29 = sadd.s32 1, %s1561_s25  ;;  %s180_s30 = sadd.s32 1, %s1553_s23 }
   0x6   : > { %p33_p0 = scmp.ge.s32.totalorder %s31_s29, 2  ;;  %p190_p1 = scmp.ne.s32.totalorder %s1553_s23, %s1549_s22 }
   0x7   : > { %p191_p2 = scmp.eq.s32.totalorder %s1090_s27, 1  ;;  %p196_p3 = scmp.ne.s32.totalorder %s1549_s22, %s1545_s21 }
   0x8   : > { %s2045_s29 = smov (%p33_p0, %s31_s29), 0  ;;  %p197_p5 = scmp.eq.s32.totalorder %s1091_s28, 1 }
   0x9   : > { %p1646_p4 = por %p191_p2, %p190_p1  ;;  %s175_s8 = ssub.s32 %s1561_s25, %s2045_s29 }
   0xa   : > { %p1094_p6 = scmp.ge.s32.totalorder %s1565_s26, 1  ;;  %p178_p7 = scmp.eq.s32.totalorder %s175_s8, 0 }
   0xb   : > { %p1653_p8 = por %p197_p5, %p196_p3  ;;  %p249_p9 = scmp.lt.s32.totalorder %s1565_s26, 3 }
   0xc   : > { %s1659_s10 = scalar_select %p178_p7, %s1553_s23, %s180_s30  }
   0xd   : > { %p250_p10 = pnand %p1094_p6, %p249_p9 }
   0xe   : > { %v306_v0 = vld [vmem:[%s2032_s2] sm:$0xff] (!%p250_p10)  ;;  %v307_v3 = vld [vmem:[%s2032_s2 + $0x8] sm:$0xff] (!%p250_p10)  ;;  %v554_v8 = vld [vmem:[%s2034_s4 + $0x10] sm:$0xff] (!%p250_p10)  ;;  %p290_p11 = scmp.lt.s32.totalorder (!%p250_p10), %s1557_s24, 1  ;;  %vm370_vm0 = vcmask (!%p250_p10), 261120   ;;  %vm974_vm1 = vcmask (!%p250_p10), 523264  }
   0xf   : > { %253 = sbr.rel (%p250_p10) target bundleno = 456 (0x1c8), region = 44  ;;  %338 = vxpose.xlu0.b32.start [1/4] (short) (narrow) (!%p250_p10), %v306_v0, 32  ;;  %v552_v1 = vld [vmem:[%s2034_s4] sm:$0xff] (!%p250_p10)  ;;  %v553_v5 = vld [vmem:[%s2034_s4 + $0x8] sm:$0xff] (!%p250_p10)  ;;  %v570_v9 = vld [vmem:[%s2034_s4 + $0x90] sm:$0xff] (!%p250_p10)  ;;  %s1115_s15 = sshll.u32 (!%p250_p10), %s1557_s24, 9 }
  0x10   : > { %v568_v2 = vld [vmem:[%s2034_s4 + $0x80] sm:$0xff] (!%p250_p10)  ;;  %v569_v6 = vld [vmem:[%s2034_s4 + $0x88] sm:$0xff] (!%p250_p10)  ;;  %v308_v10 = vld [vmem:[%s2032_s2 + $0x10] sm:$0xff] (!%p250_p10)  ;;  %v1361_v11 = vpack.i.bf16 (!%p250_p10), %v554_v8, %v570_v9  ;;  %s1977_s28 = scalar_lea.hbm (!%p250_p10), %s2036_s6, %s1115_s15 }
  0x11   : > { %v1357_v4 = vpack.i.bf16 (!%p250_p10), %v552_v1, %v568_v2  ;;  %v1359_v7 = vpack.i.bf16 (!%p250_p10), %v553_v5, %v569_v6  ;;  %v555_v12 = vld [vmem:[%s2034_s4 + $0x18] sm:$0xff] (!%p250_p10)  ;;  %v584_v15 = vld [vmem:[%s2034_s4 + $0x100] sm:$0xff] (!%p250_p10)  ;;  %v585_v21 = vld [vmem:[%s2034_s4 + $0x108] sm:$0xff] (!%p250_p10) }
  0x12   : > { %v571_v13 = vld [vmem:[%s2034_s4 + $0x98] sm:$0xff] (!%p250_p10)  ;;  %v600_v16 = vld [vmem:[%s2034_s4 + $0x180] sm:$0xff] (!%p250_p10)  ;;  %v601_v22 = vld [vmem:[%s2034_s4 + $0x188] sm:$0xff] (!%p250_p10) }
  0x13   : > { %1358 = vxpose.xlu1.b32.start [1/16] (narrow) (!%p250_p10), %v1357_v4, 32  ;;  %339 = vxpose.xlu0.b32.cont [2/4] (short) (narrow) (!%p250_p10), %v307_v3, 32  ;;  %v309_v14 = vld [vmem:[%s2032_s2 + $0x18] sm:$0xff] (!%p250_p10)  ;;  %v1363_v17 = vpack.i.bf16 (!%p250_p10), %v555_v12, %v571_v13  ;;  %v1409_v18 = vpack.i.bf16 (!%p250_p10), %v584_v15, %v600_v16  ;;  %v556_v19 = vld [vmem:[%s2034_s4 + $0x20] sm:$0xff] (!%p250_p10)  ;;  %v1411_v24 = vpack.i.bf16 (!%p250_p10), %v585_v21, %v601_v22  ;;  %v557_v25 = vld [vmem:[%s2034_s4 + $0x28] sm:$0xff] (!%p250_p10) }
  0x14   : > { %v572_v20 = vld [vmem:[%s2034_s4 + $0xa0] sm:$0xff] (!%p250_p10)  ;;  %v573_v26 = vld [vmem:[%s2034_s4 + $0xa8] sm:$0xff] (!%p250_p10)  ;;  %v586_v27 = vld [vmem:[%s2034_s4 + $0x110] sm:$0xff] (!%p250_p10) }
  0x15   : > { %v1365_v23 = vpack.i.bf16 (!%p250_p10), %v556_v19, %v572_v20  ;;  %v602_v28 = vld [vmem:[%s2034_s4 + $0x190] sm:$0xff] (!%p250_p10)  ;;  %v1367_v29 = vpack.i.bf16 (!%p250_p10), %v557_v25, %v573_v26  ;;  %v587_v33 = vld [vmem:[%s2034_s4 + $0x118] sm:$0xff] (!%p250_p10)  ;;  %v588_v42 = vld [vmem:[%s2034_s4 + $0x120] sm:$0xff] (!%p250_p10) }
  0x16   : > { %s291_s11 = scalar_select %p290_p11, %s1557_s24, 1  ;;  %v1413_v30 = vpack.i.bf16 %v586_v27, %v602_v28  ;;  %v558_v31 = vld [vmem:[%s2034_s4 + $0x30] sm:$0xff]  ;;  %v603_v34 = vld [vmem:[%s2034_s4 + $0x198] sm:$0xff]  ;;  %v604_v43 = vld [vmem:[%s2034_s4 + $0x1a0] sm:$0xff] }
  0x17   : > { %1360 = vxpose.xlu1.b32.cont [2/16] (narrow) %v1359_v7, 32  ;;  %340 = vxpose.xlu0.b32.cont [3/4] (short) (narrow) %v308_v10, 32  ;;  %v574_v32 = vld [vmem:[%s2034_s4 + $0xb0] sm:$0xff]  ;;  %v559_v36 = vld [vmem:[%s2034_s4 + $0x38] sm:$0xff]  ;;  %v1415_v49 = vpack.i.bf16 %v587_v33, %v603_v34  ;;  %v560_v58 = vld [vmem:[%s2034_s4 + $0x40] sm:$0xff]  ;;  %v1417_v3 = vpack.i.bf16 %v588_v42, %v604_v43 }
  0x18   : > { %s1114_s20 = sshll.u32 %s291_s11, 9  ;;  %s1113_s16 = sshll.u32 %s291_s11, 5  ;;  %v575_v37 = vld [vmem:[%s2034_s4 + $0xb8] sm:$0xff]  ;;  %v1369_v41 = vpack.i.bf16 %v558_v31, %v574_v32  ;;  %v576_v4 = vld [vmem:[%s2034_s4 + $0xc0] sm:$0xff]  ;;  %v589_v8 = vld [vmem:[%s2034_s4 + $0x128] sm:$0xff] }
  0x19   : > { %s1732_s19 = scalar_lea.vmem %s2031_s1, %s1114_s20  ;;  %s297_s20 = scalar_lea.vmem %s2030_s0, %s1113_s16  ;;  %v1371_v63 = vpack.i.bf16 %v559_v36, %v575_v37  ;;  %v605_v9 = vld [vmem:[%s2034_s4 + $0x1a8] sm:$0xff]  ;;  %v1373_v12 = vpack.i.bf16 %v560_v58, %v576_v4  ;;  %v590_v21 = vld [vmem:[%s2034_s4 + $0x130] sm:$0xff]  ;;  %v591_v33 = vld [vmem:[%s2034_s4 + $0x138] sm:$0xff] }
  0x1a   : > { %v504_v35 = vld [vmem:[%s1732_s19 + $0x80] sm:$0xff]  ;;  %v505_v38 = vld [vmem:[%s1732_s19 + $0x88] sm:$0xff]  ;;  %v506_v48 = vld [vmem:[%s1732_s19 + $0x90] sm:$0xff]  ;;  %s1568_s16 = smov [#allocation2]  }
  0x1b   : > { %1362 = vxpose.xlu1.b32.cont [3/16] (narrow) %v1361_v11, 32  ;;  %341 = vxpose.xlu0.b32.end [4/4] (short) (narrow) %v309_v14, 32  ;;  %v488_v39 = vld [vmem:[%s1732_s19] sm:$0xff]  ;;  %v489_v40 = vld [vmem:[%s1732_s19 + $0x8] sm:$0xff]  ;;  %v1234_v44 = vpack.c.bf16 %v505_v38, %v504_v35  ;;  %v507_v51 = vld [vmem:[%s1732_s19 + $0x98] sm:$0xff]  ;;  %s1491_s8 = sshll.u32 %s1568_s16, 4  ;;  %s1492_s8 = int_to_ptr.vmem [resolvable:$false] %s1491_s8 }
  0x1c   : > { %v1236_v45 = vpack.c.bf16 %v489_v40, %v488_v39  ;;  %v310_v46 = vld [vmem:[%s297_s20] sm:$0xff]  ;;  %v311_v47 = vld [vmem:[%s297_s20 + $0x8] sm:$0xff]  ;;  %v490_v52 = vld [vmem:[%s1732_s19 + $0x10] sm:$0xff]  ;;  %v1238_v54 = vpack.c.bf16 %v507_v51, %v506_v48  ;;  %s1493_s11 = scalar_lea.vmem %s1492_s8, 1024 }
  0x1d   : > { %v1226_v50 = vpack.c.bf16 %v311_v47, %v310_v46  ;;  %v491_v53 = vld [vmem:[%s1732_s19 + $0x18] sm:$0xff]  ;;  %1235 = vmatprep.subr.bf16.mxu1 %v1234_v44  ;;  %v312_v55 = vld [vmem:[%s297_s20 + $0x10] sm:$0xff]  ;;  %v508_v57 = vld [vmem:[%s1732_s19 + $0xa0] sm:$0xff] }
  0x1e   : > { %v313_v56 = vld [vmem:[%s297_s20 + $0x18] sm:$0xff]  ;;  %1237 = vmatpush3.bf16.msra.mxu1 %v1236_v45  ;;  %v1240_v59 = vpack.c.bf16 %v491_v53, %v490_v52  ;;  %v509_v61 = vld [vmem:[%s1732_s19 + $0xa8] sm:$0xff]  ;;  %v492_v62 = vld [vmem:[%s1732_s19 + $0x20] sm:$0xff] }
  0x1f   : > { %1364 = vxpose.xlu1.b32.cont [4/16] (narrow) %v1363_v17, 32  ;;  %1410 = vxpose.xlu0.b32.start [1/16] (narrow) %v1409_v18, 32  ;;  %v1230_v60 = vpack.c.bf16 %v313_v56, %v312_v55  ;;  %v493_v0 = vld [vmem:[%s1732_s19 + $0x28] sm:$0xff]  ;;  %v536_v1 = vld [vmem:[%s1732_s19 + $0x180] sm:$0xff]  ;;  %v1242_v5 = vpack.c.bf16 %v509_v61, %v508_v57  ;;  %v510_v6 = vld [vmem:[%s1732_s19 + $0xb0] sm:$0xff]  ;;  %v1419_v17 = vpack.i.bf16 %v589_v8, %v605_v9 }
  0x20   : > { %1227 = vmatprep.subr.bf16.mxu0 %v1226_v50  ;;  %v537_v2 = vld [vmem:[%s1732_s19 + $0x188] sm:$0xff]  ;;  %1239 = vmatprep.subr.bf16.mxu1 %v1238_v54  ;;  %v511_v7 = vld [vmem:[%s1732_s19 + $0xb8] sm:$0xff]  ;;  %v1244_v11 = vpack.c.bf16 %v493_v0, %v492_v62  ;;  %v494_v15 = vld [vmem:[%s1732_s19 + $0x30] sm:$0xff] }
  0x21   : > { %1229 = vmatpush3.bf16.msra.mxu0 %v1226_v50  ;;  %v1266_v10 = vpack.c.bf16 %v537_v2, %v536_v1  ;;  %v561_v13 = vld [vmem:[%s2034_s4 + $0x48] sm:$0xff]  ;;  %v1246_v14 = vpack.c.bf16 %v511_v7, %v510_v6  ;;  %v495_v16 = vld [vmem:[%s1732_s19 + $0x38] sm:$0xff]  ;;  %v512_v19 = vld [vmem:[%s1732_s19 + $0xc0] sm:$0xff] }
  0x22   : > { %1231 = vmatprep.subr.bf16.mxu0 %v1230_v60  ;;  %1241 = vmatpush3.bf16.msra.mxu1 %v1240_v59  ;;  %v577_v18 = vld [vmem:[%s2034_s4 + $0xc8] sm:$0xff]  ;;  %v606_v22 = vld [vmem:[%s2034_s4 + $0x1b0] sm:$0xff]  ;;  %v496_v27 = vld [vmem:[%s1732_s19 + $0x40] sm:$0xff] }
  0x23   : > { %1366 = vxpose.xlu1.b32.cont [5/16] (narrow) %v1365_v23, 32  ;;  %1412 = vxpose.xlu0.b32.cont [2/16] (narrow) %v1411_v24, 32  ;;  %v513_v20 = vld [vmem:[%s1732_s19 + $0xc8] sm:$0xff]  ;;  %v1248_v23 = vpack.c.bf16 %v495_v16, %v494_v15  ;;  %v1375_v24 = vpack.i.bf16 %v561_v13, %v577_v18  ;;  %v562_v25 = vld [vmem:[%s2034_s4 + $0x50] sm:$0xff]  ;;  %v515_v32 = vld [vmem:[%s1732_s19 + $0xd8] sm:$0xff] }
  0x24   : > { %1243 = vmatprep.subr.bf16.mxu1 %v1242_v5  ;;  %v1250_v26 = vpack.c.bf16 %v513_v20, %v512_v19  ;;  %v497_v28 = vld [vmem:[%s1732_s19 + $0x48] sm:$0xff]  ;;  %v514_v31 = vld [vmem:[%s1732_s19 + $0xd0] sm:$0xff]  ;;  %v607_v34 = vld [vmem:[%s2034_s4 + $0x1b8] sm:$0xff] }
  0x25   : > { %1233 = vmatpush3.bf16.msra.mxu0 %v1230_v60  ;;  %v1252_v35 = vpack.c.bf16 %v497_v28, %v496_v27  ;;  %v563_v37 = vld [vmem:[%s2034_s4 + $0x58] sm:$0xff]  ;;  %v1254_v38 = vpack.c.bf16 %v515_v32, %v514_v31  ;;  %v498_v39 = vld [vmem:[%s1732_s19 + $0x50] sm:$0xff]  ;;  %v516_v43 = vld [vmem:[%s1732_s19 + $0xe0] sm:$0xff] }
  0x26   : > { %1267 = vmatprep.subr.bf16.mxu0 %v1266_v10  ;;  %1245 = vmatpush3.bf16.msra.mxu1 %v1244_v11  ;;  %v499_v40 = vld [vmem:[%s1732_s19 + $0x58] sm:$0xff]  ;;  %v517_v44 = vld [vmem:[%s1732_s19 + $0xe8] sm:$0xff]  ;;  %v592_v45 = vld [vmem:[%s2034_s4 + $0x140] sm:$0xff] }
  0x27   : > { %1368 = vxpose.xlu1.b32.cont [6/16] (narrow) %v1367_v29, 32  ;;  %1414 = vxpose.xlu0.b32.cont [3/16] (narrow) %v1413_v30, 32  ;;  %v1421_v29 = vpack.i.bf16 %v590_v21, %v606_v22  ;;  %v578_v30 = vld [vmem:[%s2034_s4 + $0xd0] sm:$0xff]  ;;  %v579_v42 = vld [vmem:[%s2034_s4 + $0xd8] sm:$0xff]  ;;  %v608_v46 = vld [vmem:[%s2034_s4 + $0x1c0] sm:$0xff]  ;;  %v1256_v47 = vpack.c.bf16 %v499_v40, %v498_v39  ;;  %v1258_v50 = vpack.c.bf16 %v517_v44, %v516_v43 }
  0x28   : > { %1247 = vmatprep.subr.bf16.mxu1 %v1246_v14  ;;  %v1377_v36 = vpack.i.bf16 %v562_v25, %v578_v30  ;;  %v1379_v48 = vpack.i.bf16 %v563_v37, %v579_v42  ;;  %v500_v51 = vld [vmem:[%s1732_s19 + $0x60] sm:$0xff]  ;;  %v501_v52 = vld [vmem:[%s1732_s19 + $0x68] sm:$0xff]  ;;  %v1425_v53 = vpack.i.bf16 %v592_v45, %v608_v46  ;;  %v518_v55 = vld [vmem:[%s1732_s19 + $0xf0] sm:$0xff]  ;;  %v1567_v30 = vmov 0  }
  0x29   : > { %v580_v54 = vld [vmem:[%s2034_s4 + $0xe0] sm:$0xff]  ;;  %v519_v56 = vld [vmem:[%s1732_s19 + $0xf8] sm:$0xff]  ;;  %v593_v57 = vld [vmem:[%s2034_s4 + $0x148] sm:$0xff]  ;;  %v1260_v59 = vpack.c.bf16 %v501_v52, %v500_v51 }
  0x2a   : > { %1249 = vmatpush3.bf16.msra.mxu1 %v1248_v23  ;;  %v609_v58 = vld [vmem:[%s2034_s4 + $0x1c8] sm:$0xff]  ;;  %v1262_v61 = vpack.c.bf16 %v519_v56, %v518_v55  ;;  %v502_v62 = vld [vmem:[%s1732_s19 + $0x70] sm:$0xff]  ;;  %v595_v10 = vld [vmem:[%s2034_s4 + $0x158] sm:$0xff] }
  0x2b   : > { %1370 = vxpose.xlu1.b32.cont [7/16] (narrow) %v1369_v41, 32  ;;  %1416 = vxpose.xlu0.b32.cont [4/16] (narrow) %v1415_v49, 32  ;;  %v1423_v41 = vpack.i.bf16 %v591_v33, %v607_v34  ;;  %v564_v49 = vld [vmem:[%s2034_s4 + $0x60] sm:$0xff]  ;;  %v1427_v0 = vpack.i.bf16 %v593_v57, %v609_v58  ;;  %v565_v1 = vld [vmem:[%s2034_s4 + $0x68] sm:$0xff]  ;;  %v610_v4 = vld [vmem:[%s2034_s4 + $0x1d0] sm:$0xff] }
  0x2c   : > { %1251 = vmatprep.subr.bf16.mxu1 %v1250_v26  ;;  %v1381_v60 = vpack.i.bf16 %v564_v49, %v580_v54  ;;  %v581_v2 = vld [vmem:[%s2034_s4 + $0xe8] sm:$0xff]  ;;  %v566_v8 = vld [vmem:[%s2034_s4 + $0x70] sm:$0xff]  ;;  %v611_v11 = vld [vmem:[%s2034_s4 + $0x1d8] sm:$0xff] }
  0x2d   : > { %v1383_v6 = vpack.i.bf16 %v565_v1, %v581_v2  ;;  %v582_v9 = vld [vmem:[%s2034_s4 + $0xf0] sm:$0xff]  ;;  %v1431_v13 = vpack.i.bf16 %v595_v10, %v611_v11  ;;  %v567_v14 = vld [vmem:[%s2034_s4 + $0x78] sm:$0xff]  ;;  %v596_v16 = vld [vmem:[%s2034_s4 + $0x160] sm:$0xff] }
  0x2e   : > { %1253 = vmatpush3.bf16.msra.mxu1 %v1252_v35  ;;  %v583_v15 = vld [vmem:[%s2034_s4 + $0xf8] sm:$0xff]  ;;  %v597_v20 = vld [vmem:[%s2034_s4 + $0x168] sm:$0xff]  ;;  %v598_v23 = vld [vmem:[%s2034_s4 + $0x170] sm:$0xff] }
  0x2f   : > { %1372 = vxpose.xlu1.b32.cont [8/16] (narrow) %v1371_v63, 32  ;;  %1418 = vxpose.xlu0.b32.cont [5/16] (narrow) %v1417_v3, 32  ;;  %v503_v63 = vld [vmem:[%s1732_s19 + $0x78] sm:$0xff]  ;;  %v594_v3 = vld [vmem:[%s2034_s4 + $0x150] sm:$0xff]  ;;  %v1387_v18 = vpack.i.bf16 %v567_v14, %v583_v15  ;;  %v613_v21 = vld [vmem:[%s2034_s4 + $0x1e8] sm:$0xff] }
  0x30   : > { %1255 = vmatprep.subr.bf16.mxu1 %v1254_v38  ;;  %v1264_v5 = vpack.c.bf16 %v503_v63, %v502_v62  ;;  %v1429_v7 = vpack.i.bf16 %v594_v3, %v610_v4  ;;  %v1435_v22 = vpack.i.bf16 %v597_v20, %v613_v21  ;;  %v599_v26 = vld [vmem:[%s2034_s4 + $0x178] sm:$0xff]  ;;  %v618_v31 = vld [vmem:[%s2035_s5 + $0x10] sm:$0xff]  ;;  %v314_v33 = vld [vmem:[%s2033_s3] sm:$0xff] }
  0x31   : > { %v615_v27 = vld [vmem:[%s2034_s4 + $0x1f8] sm:$0xff]  ;;  %v315_v34 = vld [vmem:[%s2033_s3 + $0x8] sm:$0xff]  ;;  %v316_v35 = vld [vmem:[%s2033_s3 + $0x10] sm:$0xff] }
  0x32   : > { %1257 = vmatpush3.bf16.msra.mxu1 %v1256_v47  ;;  %v1439_v28 = vpack.i.bf16 %v599_v26, %v615_v27  ;;  %v619_v32 = vld [vmem:[%s2035_s5 + $0x18] sm:$0xff]  ;;  %v617_v37 = vld [vmem:[%s2035_s5 + $0x8] sm:$0xff]  ;;  %v520_v38 = vld [vmem:[%s1732_s19 + $0x100] sm:$0xff] }
  0x33   : > { %1374 = vxpose.xlu1.b32.cont [9/16] (narrow) %v1373_v12, 32  ;;  %1420 = vxpose.xlu0.b32.cont [6/16] (narrow) %v1419_v17, 32  ;;  %v1385_v12 = vpack.i.bf16 %v566_v8, %v582_v9  ;;  %v612_v17 = vld [vmem:[%s2034_s4 + $0x1e0] sm:$0xff]  ;;  %v521_v39 = vld [vmem:[%s1732_s19 + $0x108] sm:$0xff]  ;;  %v539_v42 = vld [vmem:[%s1732_s19 + $0x198] sm:$0xff] }
  0x34   : > { %1259 = vmatprep.subr.bf16.mxu1 %v1258_v50  ;;  %v1433_v19 = vpack.i.bf16 %v596_v16, %v612_v17  ;;  %v1268_v43 = vpack.c.bf16 %v521_v39, %v520_v38  ;;  %v522_v45 = vld [vmem:[%s1732_s19 + $0x110] sm:$0xff]  ;;  %v523_v46 = vld [vmem:[%s1732_s19 + $0x118] sm:$0xff]  ;;  %v540_v49 = vld [vmem:[%s1732_s19 + $0x1a0] sm:$0xff] }
  0x35   : > { %v541_v50 = vld [vmem:[%s1732_s19 + $0x1a8] sm:$0xff]  ;;  %v524_v55 = vld [vmem:[%s1732_s19 + $0x120] sm:$0xff]  ;;  %v526_v1 = vld [vmem:[%s1732_s19 + $0x130] sm:$0xff] }
  0x36   : > { %1261 = vmatpush3.bf16.msra.mxu1 %v1260_v59  ;;  %v1274_v54 = vpack.c.bf16 %v541_v50, %v540_v49  ;;  %v525_v56 = vld [vmem:[%s1732_s19 + $0x128] sm:$0xff]  ;;  %v542_v59 = vld [vmem:[%s1732_s19 + $0x1b0] sm:$0xff]  ;;  %v527_v2 = vld [vmem:[%s1732_s19 + $0x138] sm:$0xff] }
  0x37   : > { %1376 = vxpose.xlu1.b32.cont [10/16] (narrow) %v1375_v24, 32  ;;  %1422 = vxpose.xlu0.b32.cont [7/16] (narrow) %v1421_v29, 32  ;;  %v614_v24 = vld [vmem:[%s2034_s4 + $0x1f0] sm:$0xff]  ;;  %v616_v29 = vld [vmem:[%s2035_s5] sm:$0xff]  ;;  %v1276_v63 = vpack.c.bf16 %v525_v56, %v524_v55  ;;  %v1280_v9 = vpack.c.bf16 %v527_v2, %v526_v1  ;;  %v547_v15 = vld [vmem:[%s1732_s19 + $0x1d8] sm:$0xff] }
  0x38   : > { %1263 = vmatprep.subr.bf16.mxu1 %v1262_v61  ;;  %v1437_v25 = vpack.i.bf16 %v598_v23, %v614_v24  ;;  %v528_v11 = vld [vmem:[%s1732_s19 + $0x140] sm:$0xff]  ;;  %v546_v14 = vld [vmem:[%s1732_s19 + $0x1d0] sm:$0xff]  ;;  %v531_v23 = vld [vmem:[%s1732_s19 + $0x158] sm:$0xff] }
  0x39   : > { %v1286_v21 = vpack.c.bf16 %v547_v15, %v546_v14  ;;  %v548_v24 = vld [vmem:[%s1732_s19 + $0x1e0] sm:$0xff] }
  0x3a   : > { %1265 = vmatpush3.bf16.msra.mxu1 %v1264_v5  ;;  %v544_v5 = vld [vmem:[%s1732_s19 + $0x1c0] sm:$0xff] }
  0x3b   : > { %1378 = vxpose.xlu1.b32.cont [11/16] (narrow) %v1377_v36, 32  ;;  %1424 = vxpose.xlu0.b32.cont [8/16] (narrow) %v1423_v41, 32  ;;  %v317_v36 = vld [vmem:[%s2033_s3 + $0x18] sm:$0xff]  ;;  %v538_v41 = vld [vmem:[%s1732_s19 + $0x190] sm:$0xff] }
  0x3c   : > { %v1270_v44 = vpack.c.bf16 %v539_v42, %v538_v41 }
  0x3f   : > { %1380 = vxpose.xlu1.b32.cont [12/16] (narrow) %v1379_v48, 32  ;;  %1426 = vxpose.xlu0.b32.cont [9/16] (narrow) %v1425_v53, 32  ;;  %v1272_v53 = vpack.c.bf16 %v523_v46, %v522_v45 }
  0x43   : > { %1382 = vxpose.xlu1.b32.cont [13/16] (narrow) %v1381_v60, 32  ;;  %1428 = vxpose.xlu0.b32.cont [10/16] (narrow) %v1427_v0, 32  ;;  %v543_v60 = vld [vmem:[%s1732_s19 + $0x1b8] sm:$0xff] }
  0x44   : > { %v1278_v0 = vpack.c.bf16 %v543_v60, %v542_v59 }
  0x47   : > { %1384 = vxpose.xlu1.b32.cont [14/16] (narrow) %v1383_v6, 32  ;;  %1430 = vxpose.xlu0.b32.cont [11/16] (narrow) %v1429_v7, 32  ;;  %v545_v6 = vld [vmem:[%s1732_s19 + $0x1c8] sm:$0xff] }
  0x48   : > { %v1282_v10 = vpack.c.bf16 %v545_v6, %v544_v5 }
  0x4b   : > { %1386 = vxpose.xlu1.b32.cont [15/16] (narrow) %v1385_v12, 32  ;;  %1432 = vxpose.xlu0.b32.cont [12/16] (narrow) %v1431_v13, 32  ;;  %v529_v12 = vld [vmem:[%s1732_s19 + $0x148] sm:$0xff] }
  0x4c   : > { %v1284_v20 = vpack.c.bf16 %v529_v12, %v528_v11 }
  0x4f   : > { %1388 = vxpose.xlu1.b32.end [16/16] (narrow) %v1387_v18, 32  ;;  %1434 = vxpose.xlu0.b32.cont [13/16] (narrow) %v1433_v19, 32 }
  0x53   : > { %1436 = vxpose.xlu0.b32.cont [14/16] (narrow) %v1435_v22, 32  ;;  %v530_v22 = vld [vmem:[%s1732_s19 + $0x150] sm:$0xff] }
  0x54   : > { %v1288_v27 = vpack.c.bf16 %v531_v23, %v530_v22 }
  0x57   : > { %1438 = vxpose.xlu0.b32.cont [15/16] (narrow) %v1437_v25, 32  ;;  %v549_v25 = vld [vmem:[%s1732_s19 + $0x1e8] sm:$0xff] }
  0x5b   : > { %1440 = vxpose.xlu0.b32.end [16/16] (narrow) %v1439_v28, 32  ;;  %v1290_v28 = vpack.c.bf16 %v549_v25, %v548_v24 }
  0x6d   : > { %1461 = vset.pattern.permute.xlu1 %v1567_v30 }
  0x6e   : > { %622 = vperm.xlu1 %1461, %v616_v29   ;;  %v532_v29 = vld [vmem:[%s1732_s19 + $0x160] sm:$0xff] }
  0x72   : > { %632 = vperm.xlu1 %1461, %v618_v31   ;;  %v550_v31 = vld [vmem:[%s1732_s19 + $0x1f0] sm:$0xff] }
  0x76   : > { %637 = vperm.xlu1 %1461, %v619_v32   ;;  %v551_v32 = vld [vmem:[%s1732_s19 + $0x1f8] sm:$0xff] }
  0x7a   : > { %320 = vperm.xlu1 %1461, %v314_v33  }
  0x7e   : > { %325 = vperm.xlu1 %1461, %v315_v34  }
  0x82   : > { %330 = vperm.xlu1 %1461, %v316_v35   ;;  %v1294_v35 = vpack.c.bf16 %v551_v32, %v550_v31 }
  0x84   : > { %1462 = vset.pattern.permute.xlu0 %v1567_v30  ;;  %v533_v30 = vld [vmem:[%s1732_s19 + $0x168] sm:$0xff] }
  0x85   : > { %627 = vperm.xlu0 %1462, %v617_v37   ;;  %v1292_v34 = vpack.c.bf16 %v533_v30, %v532_v29  ;;  %v535_v37 = vld [vmem:[%s1732_s19 + $0x178] sm:$0xff] }
  0x86   : > { %335 = vperm.xlu1 %1461, %v317_v36   ;;  %v534_v36 = vld [vmem:[%s1732_s19 + $0x170] sm:$0xff]  ;;  %s287_s19 = sand.u32 1, %s1549_s22  }
  0x87   : > { %v1296_v39 = vpack.c.bf16 %v535_v37, %v534_v36  ;;  %s1095_s14 = sshll.u32 %s287_s19, 5  ;;  %s1984_s24 = scalar_lea.sflag [#allocation3], %s287_s19 }
  0x88   : > { %s289_s20 = scalar_lea.vmem [#allocation2], %s1095_s14 }
  0x89   : > { %s994_s17 = sshll.u32 %s289_s20, 4  ;;  %s1979_s17 = int_to_ptr.vmem [resolvable:$true] %s994_s17 }
  0x8a   : > { %s1487_s30 = scalar_lea.vmem %s1979_s17, 512  ;;  %p1494_p1 = scmp.lt.s32.totalorder %s1979_s17, %s1492_s8 }
  0x8b   : > { %p1488_p12 = scmp.ne.s32.totalorder %s1979_s17, %s1487_s30  ;;  %p1495_p2 = scmp.lt.s32.totalorder %s1493_s11, %s1487_s30 }
  0x8d   : > { %p1489_p13 = pnand %p1488_p12, %p1646_p4  ;;  %p1496_p3 = por %p1495_p2, %p1494_p1 }
  0x8f   : > { %v354_v40 = vpop.trf.xlu0  ;;  %p1490_p0 = pneg %p1489_p13 }
  0x90   : > { %1220 = vmatprep.mubr.msk.f32.mxu0 %vm370_vm0, %v354_v40 }
  0x91   : > { %p1497_p5 = pnand %p1496_p3, %p1490_p0 }
  0x93   : > { %v1389_v47 = vpop.trf.xlu1  ;;  %v355_v48 = vpop.trf.xlu0 }
  0x94   : > { %v1390_v51 = vunpack.i.l.bf16 %v1389_v47  ;;  %v1393_v52 = vunpack.i.h.bf16 %v1389_v47  ;;  %1221 = vmatmul.mubr.msk.f32.vlgmr.msra.gmra.mrb[0].mxu0 %vm370_vm0, %v355_v48 }
  0x95   : > { %1269 = vmatpush3.bf16.msra.mxu0 %v1268_v43 }
  0x96   : > { %832 = vmatprep.mubr.f32.mxu1 %v1390_v51  ;;  %1271 = vmatprep.subr.bf16.mxu0 %v1270_v44 }
  0x97   : > { %v1394_v57 = vpop.trf.xlu1  ;;  %833 = vmatmul.mubr.f32.vlgmr.msra.gmra.mrb[0].mxu1 %v1393_v52  ;;  %v356_v58 = vpop.trf.xlu0 }
  0x98   : > { %v1395_v61 = vunpack.i.l.bf16 %v1394_v57  ;;  %v1398_v62 = vunpack.i.h.bf16 %v1394_v57  ;;  %1223 = vmatprep.mubr.msk.f32.mxu0 %vm370_vm0, %v356_v58 }
  0x99   : > { %1273 = vmatpush3.bf16.msra.mxu0 %v1272_v53 }
  0x9a   : > { %837 = vmatprep.mubr.f32.mxu1 %v1395_v61  ;;  %1275 = vmatprep.subr.bf16.mxu0 %v1274_v54 }
  0x9b   : > { %v1399_v3 = vpop.trf.xlu1  ;;  %838 = vmatmul.mubr.f32.gmra.mrb[2].mxu1 %v1398_v62  ;;  %v357_v4 = vpop.trf.xlu0 }
  0x9c   : > { %v1400_v7 = vunpack.i.l.bf16 %v1399_v3  ;;  %v1403_v8 = vunpack.i.h.bf16 %v1399_v3  ;;  %1224 = vmatmul.mubr.msk.f32.gmra.mrb[2].mxu0 %vm370_vm0, %v357_v4 }
  0x9d   : > { %1277 = vmatpush3.bf16.msra.mxu0 %v1276_v63 }
  0x9e   : > { %842 = vmatprep.mubr.f32.mxu1 %v1400_v7  ;;  %1279 = vmatprep.subr.bf16.mxu0 %v1278_v0 }
  0x9f   : > { %v1404_v13 = vpop.trf.xlu1  ;;  %843 = vmatmul.mubr.f32.gmra.mrb[4].mxu1 %v1403_v8  ;;  %v1441_v16 = vpop.trf.xlu0 }
  0xa0   : > { %v1405_v17 = vunpack.i.l.bf16 %v1404_v13  ;;  %v1408_v18 = vunpack.i.h.bf16 %v1404_v13  ;;  %v1442_v19 = vunpack.i.l.bf16 %v1441_v16  ;;  %v1445_v40 = vunpack.i.h.bf16 %v1441_v16 }
  0xa1   : > { %1281 = vmatpush3.bf16.msra.mxu0 %v1280_v9 }
  0xa2   : > { %847 = vmatprep.mubr.f32.mxu1 %v1405_v17  ;;  %1283 = vmatprep.subr.bf16.mxu0 %v1282_v10 }
  0xa3   : > { %917 = vmatprep.mubr.f32.mxu0 %v1442_v19  ;;  %v1446_v26 = vpop.trf.xlu0  ;;  %848 = vmatmul.mubr.f32.gmra.mrb[6].mxu1 %v1408_v18 }
  0xa4   : > { %v1447_v41 = vunpack.i.l.bf16 %v1446_v26  ;;  %v1450_v42 = vunpack.i.h.bf16 %v1446_v26 }
  0xa5   : > { %1285 = vmatpush3.bf16.msra.mxu0 %v1284_v20 }
  0xa6   : > { %1287 = vmatprep.subr.bf16.mxu0 %v1286_v21 }
  0xa7   : > { %v1451_v33 = vpop.trf.xlu0 }
  0xa8   : > { %v1452_v43 = vunpack.i.l.bf16 %v1451_v33  ;;  %v1455_v44 = vunpack.i.h.bf16 %v1451_v33 }
  0xa9   : > { %1289 = vmatpush3.bf16.msra.mxu0 %v1288_v27 }
  0xaa   : > { %1291 = vmatprep.subr.bf16.mxu0 %v1290_v28 }
  0xab   : > { %v1456_v38 = vpop.trf.xlu0 }
  0xac   : > { %v1457_v45 = vunpack.i.l.bf16 %v1456_v38  ;;  %v1460_v46 = vunpack.i.h.bf16 %v1456_v38 }
  0xad   : > { %1293 = vmatpush3.bf16.msra.mxu0 %v1292_v34 }
  0xae   : > { %1295 = vmatprep.subr.bf16.mxu0 %v1294_v35 }
  0xb1   : > { %1297 = vmatpush3.bf16.msra.mxu0 %v1296_v39 }
  0xb4   : > { %918 = vmatmul.mubr.f32.vlgmr.msra.gmra.mrb[4].mxu0 %v1445_v40 }
  0xb5   : > { %922 = vmatprep.mubr.f32.mxu0 %v1447_v41 }
  0xb8   : > { %923 = vmatmul.mubr.f32.gmra.mrb[6].mxu0 %v1450_v42 }
  0xb9   : > { %927 = vmatprep.mubr.f32.mxu0 %v1452_v43 }
  0xbc   : > { %928 = vmatmul.mubr.f32.gmra.mrb[8].mxu0 %v1455_v44 }
  0xbd   : > { %932 = vmatprep.mubr.f32.mxu0 %v1457_v45 }
  0xc0   : > { %933 = vmatmul.mubr.f32.gmra.mrb[10].mxu0 %v1460_v46 }
  0xed   : > { %v623_v60 = vpop.permute.xlu1 %622 }
  0xf1   : > { %v633_v0 = vpop.permute.xlu1 %632 }
  0xf5   : > { %v638_v1 = vpop.permute.xlu1 %637 }
  0xf9   : > { %v321_v3 = vpop.permute.xlu1 %320 }
  0xfd   : > { %v326_v14 = vpop.permute.xlu1 %325 }
 0x101   : > { %v331_v23 = vpop.permute.xlu1 %330 }
 0x104   : > { %v628_v7 = vpop.permute.xlu0 %627 }
 0x105   : > { %v336_v34 = vpop.permute.xlu1 %335 }
 0x167   : > { %v1222_v47 = vpop.f32.mrb[0].mxu0 }
 0x168   : > { %v449_v48 = vpop.f32.mrb[1].mxu0  ;;  %v455_v22 = vadd.f32 %v1222_v47, %v326_v14 }
 0x169   : > { %v450_v17 = vadd.f32 %v449_v48, %v321_v3 }
 0x16a   : > { %v1156_v49 = vpop.f32.mrb[0].mxu1  ;;  %v473_v31 = vmul.f32 0.70710677, %v455_v22 }
 0x16b   : > { %v1157_v50 = vpop.f32.mrb[1].mxu1  ;;  %v472_v26 = vmul.f32 0.70710677, %v450_v17 }
 0x16c   : > { %v1158_v51 = vadd.f32 %v1157_v50, %v1156_v49 }
 0x16e   : > { %v1159_v52 = vpop.f32.mrb[2].mxu1  ;;  %v835_v5 = vadd.f32 %v1158_v51, %v623_v60  ;;  %v468_v51 = vmul.f32 0.5, %v450_v17 }
 0x16f   : > { %v1160_v53 = vpop.f32.mrb[3].mxu1  ;;  %v1225_v54 = vpop.f32.mrb[2].mxu0 }
 0x170   : > { %v1161_v55 = vadd.f32 %v1160_v53, %v1159_v52  ;;  %v459_v56 = vpop.f32.mrb[3].mxu0  ;;  %v465_v38 = vadd.f32 %v1225_v54, %v336_v34 }
 0x171   : > { %v460_v32 = vadd.f32 %v459_v56, %v331_v23 }
 0x172   : > { %v1162_v57 = vpop.f32.mrb[4].mxu1  ;;  %v840_v12 = vadd.f32 %v1161_v55, %v628_v7  ;;  %v475_v42 = vmul.f32 0.70710677, %v465_v38 }
 0x173   : > { %v1163_v58 = vpop.f32.mrb[5].mxu1  ;;  %v474_v39 = vmul.f32 0.70710677, %v460_v32 }
 0x174   : > { %v1164_v59 = vadd.f32 %v1163_v58, %v1162_v57  ;;  %v469_v58 = vmul.f32 0.5, %v455_v22 }
 0x176   : > { %v1165_v61 = vpop.f32.mrb[6].mxu1  ;;  %v845_v19 = vadd.f32 %v1164_v59, %v633_v0 }
 0x177   : > { %v1166_v62 = vpop.f32.mrb[7].mxu1 }
 0x178   : > { %v1167_v63 = vadd.f32 %v1166_v62, %v1165_v61 }
 0x17a   : > { %v850_v28 = vadd.f32 %v1167_v63, %v638_v1  ;;  %v470_v63 = vmul.f32 0.5, %v460_v32 }
 0x187   : > { %v1200_v2 = vpop.f32.mrb[4].mxu0 }
 0x188   : > { %v1201_v4 = vpop.f32.mrb[5].mxu0 }
 0x189   : > { %v1202_v6 = vadd.f32 %v1201_v4, %v1200_v2 }
 0x18b   : > { %v920_v8 = vadd.f32 %v1202_v6, %v835_v5  ;;  %v1203_v9 = vpop.f32.mrb[6].mxu0  ;;  %v471_v5 = vmul.f32 0.5, %v465_v38 }
 0x18c   : > { %v1204_v10 = vpop.f32.mrb[7].mxu0 }
 0x18d   : > { %v1104_v11 = vmul.f32 -1.442695, %v920_v8  ;;  %v1205_v13 = vadd.f32 %v1204_v10, %v1203_v9 }
 0x18f   : > { %1463 = vpow2.f32 %v1104_v11  ;;  %v925_v15 = vadd.f32 %v1205_v13, %v840_v12  ;;  %v1206_v16 = vpop.f32.mrb[8].mxu0 }
 0x190   : > { %v1207_v18 = vpop.f32.mrb[9].mxu0 }
 0x191   : > { %v1105_v20 = vmul.f32 -1.442695, %v925_v15  ;;  %v1208_v21 = vadd.f32 %v1207_v18, %v1206_v16 }
 0x193   : > { %1465 = vpow2.f32 %v1105_v20  ;;  %v930_v24 = vadd.f32 %v1208_v21, %v845_v19  ;;  %v1209_v25 = vpop.f32.mrb[10].mxu0 }
 0x194   : > { %v1210_v27 = vpop.f32.mrb[11].mxu0 }
 0x195   : > { %v1106_v29 = vmul.f32 -1.442695, %v930_v24  ;;  %v1211_v30 = vadd.f32 %v1210_v27, %v1209_v25 }
 0x197   : > { %1467 = vpow2.f32 %v1106_v29  ;;  %v935_v33 = vadd.f32 %v1211_v30, %v850_v28 }
 0x198   : > { %1469 = verf.f32 %v472_v26 }
 0x199   : > { %v1464_v35 = vpop.eup %1463  ;;  %v1107_v36 = vmul.f32 -1.442695, %v935_v33  ;;  %1471 = verf.f32 %v473_v31 }
 0x19a   : > { %v950_v37 = vadd.f32 1.0, %v1464_v35 }
 0x19b   : > { %1473 = vpow2.f32 %v1107_v36 }
 0x19c   : > { %1475 = vrcp.f32 %v950_v37 }
 0x19d   : > { %v1466_v40 = vpop.eup %1465  ;;  %1477 = verf.f32 %v474_v39 }
 0x19e   : > { %v951_v41 = vadd.f32 1.0, %v1466_v40 }
 0x1a0   : > { %1479 = vrcp.f32 %v951_v41 }
 0x1a1   : > { %v1468_v43 = vpop.eup %1467  ;;  %1481 = verf.f32 %v475_v42 }
 0x1a2   : > { %v1470_v44 = vpop.eup %1469  ;;  %v952_v45 = vadd.f32 1.0, %v1468_v43 }
 0x1a3   : > { %v1472_v46 = vpop.eup %1471  ;;  %v480_v48 = vadd.f32 1.0, %v1470_v44 }
 0x1a4   : > { %1483 = vrcp.f32 %v952_v45  ;;  %v481_v54 = vadd.f32 1.0, %v1472_v46 }
 0x1a5   : > { %v1474_v47 = vpop.eup %1473  ;;  %v484_v55 = vmul.f32 %v480_v48, %v468_v51 }
 0x1a6   : > { %v1476_v49 = vpop.eup %1475  ;;  %v953_v50 = vadd.f32 1.0, %v1474_v47  ;;  %v485_v62 = vmul.f32 %v481_v54, %v469_v58 }
 0x1a7   : > { %v962_v52 = vmul.f32 0.01, %v1476_v49  ;;  %v1478_v53 = vpop.eup %1477 }
 0x1a8   : > { %1485 = vrcp.f32 %v953_v50  ;;  %v482_v0 = vadd.f32 1.0, %v1478_v53 }
 0x1a9   : > { %v966_v56 = vadd.f32 1.0, %v962_v52 }
 0x1aa   : > { %v1480_v57 = vpop.eup %1479  ;;  %v486_v7 = vmul.f32 %v482_v0, %v470_v63 }
 0x1ab   : > { %v970_v59 = vmul.f32 %v966_v56, %v484_v55  ;;  %v963_v60 = vmul.f32 0.01, %v1480_v57  ;;  %v1482_v61 = vpop.eup %1481 }
 0x1ac   : > { %v483_v6 = vadd.f32 1.0, %v1482_v61 }
 0x1ad   : > { %975 = vst.msk [vmem:[%s289_s20] sm:$0xff] %vm974_vm1, %v970_v59  ;;  %v967_v1 = vadd.f32 1.0, %v963_v60 }
 0x1ae   : > { %v1484_v2 = vpop.eup %1483  ;;  %v487_v12 = vmul.f32 %v483_v6, %v471_v5 }
 0x1af   : > { %v971_v3 = vmul.f32 %v967_v1, %v485_v62  ;;  %v964_v4 = vmul.f32 0.01, %v1484_v2 }
 0x1b1   : > { %976 = vst.msk [vmem:[%s289_s20 + $0x8] sm:$0xff] %vm974_vm1, %v971_v3  ;;  %v968_v8 = vadd.f32 1.0, %v964_v4 }
 0x1b2   : > { %v1486_v9 = vpop.eup %1485 }
 0x1b3   : > { %v972_v10 = vmul.f32 %v968_v8, %v486_v7  ;;  %v965_v11 = vmul.f32 0.01, %v1486_v9 }
 0x1b5   : > { %977 = vst.msk [vmem:[%s289_s20 + $0x10] sm:$0xff] %vm974_vm1, %v972_v10  ;;  %v969_v13 = vadd.f32 1.0, %v965_v11 }
 0x1b7   : > { %v973_v14 = vmul.f32 %v969_v13, %v487_v12 }
 0x1b9   : > { %978 = vst.msk [vmem:[%s289_s20 + $0x18] sm:$0xff] %vm974_vm1, %v973_v14 }
 0x1ba   : > { %1500 = shalt.err (!%p1497_p5)
}
 0x1bb   : > { %s1501_s12 = scalar_lea.hbm %s1977_s28, 512  ;;  %s1505_s14 = scalar_lea.hbm %s2036_s6, 1024 }
 0x1bc   : > { %p1502_p6 = scmp.ne.s32.totalorder %s1977_s28, %s1501_s12  ;;  %p1506_p10 = scmp.lt.u32.totalorder %s1977_s28, %s2036_s6 }
 0x1bd   : > { %p1507_p11 = scmp.lt.u32.totalorder %s1505_s14, %s1501_s12  ;;  %p1509_p13 = scmp.lt.u32.totalorder %s1501_s12, %s1977_s28 }
 0x1be   : > { %p1503_p7 = pnand %p1502_p6, %p1646_p4 }
 0x1bf   : > { %p1508_p12 = por %p1507_p11, %p1506_p10 }
 0x1c0   : > { %p1504_p9 = pneg %p1503_p7 }
 0x1c1   : > { %p1510_p0 = por %p1509_p13, %p1508_p12 }
 0x1c3   : > { %p1511_p1 = pnand %p1510_p0, %p1504_p9 }
 0x1c5   : > { %1514 = shalt.err (!%p1511_p1)
}
 0x1c6   : > { %s1569_s18 = smov 128   ;;  %s1570_s27 = smov 8  }
 0x1c7   : > { %1298 = dma.vmem_to_hbm [thread:$0]  (%p1646_p4), %s1979_s17, 512, %s1977_s28, %s1984_s24, %s1569_s18, %s1569_s18, %s1570_s27  }
 0x1c8 PF: > { %p1304_p2 = scmp.ge.s32.totalorder %s1565_s26, 2  ;;  %s1009_s30 = sand.u32 1, %s1545_s21  }
 0x1c9   : > { %s1010_s16 = scalar_lea.sflag [#allocation3], %s1009_s30 }
 0x1ca   : > { %p1301_p3 = pnand %p1304_p2, %p1653_p8 }
 0x1cc   : > { %1540 = dma.done.wait (!%p1301_p3), %s1010_s16, 512  }
 0x1cd   : > { %1542 = vsyncadd (!%p1301_p3), %s1010_s16, 4294966784  ;;  %s19_s26 = sadd.s32 1, %s1565_s26   ;;  %s2039_s21 = smov %s1549_s22 }
 0x1ce   : > { %p16_p5 = scmp.ge.s32.totalorder %s19_s26, 4   ;;  %s2040_s22 = smov %s1553_s23 }
 0x1cf   : > { %s2041_s23 = smov %s1659_s10  ;;  %s2042_s24 = smov %s1561_s25 }
 0x1d0   : > { %s2043_s25 = smov %s2045_s29  ;;  %18 = sbr.rel (!%p16_p5) target bundleno = 4 (0x4), region = 82 }
 0x1d7   :  { %1015 = vsyncpa [#allocation3], 1 }
 0x1d8   :  { %1017 = vsyncpa [#allocation3 + $0x1], 1 }

</bundles_post_ra>
